<compile_context>
chip_gen: v5e
topology: v5e:2x2
jax: 0.10.0
libtpu: 0.0.40
codegen_flags: <defaults>
</compile_context>

<pallas_src>
import numpy as np
import jax
import jax.numpy as jnp
from jax.experimental import pallas as pl
from jax.experimental.pallas import tpu as pltpu


# ------------------------------ Pallas kernel -------------------------------

def _gru_obs_cell_kernel(x_ref, m_ref, h0_ref, w_ref, bx_ref, bh_ref, out_ref):
    """One grid step == one GRUObsCell.forward() event.

    x_ref  : [1, B, 2D]  dense inputs (zero rows where unobserved)
    m_ref  : [1, B, 1]   1.0 where the row is observed this event, else 0.0
    h0_ref : [B, H]      initial hidden state (consumed only at t == 0)
    w_ref  : [2D+H, 3H]  packed weights (rows [0,2D): W_i*, rows [2D,2D+H): W_h*;
                         lane gate order r | z | n)
    bx_ref : [1, 3H]     packed input biases  (b_ir | b_iz | b_in)
    bh_ref : [1, 3H]     packed hidden biases (b_hr | b_hz | b_hn)
    out_ref: [B, H]      hidden state; same block every step -> VMEM-resident
                         carry, written to HBM once at the end of the grid.
    """
    t = pl.program_id(0)

    @pl.when(t == 0)
    def _init():
        out_ref[...] = h0_ref[...]

    h = out_ref[...]                               # [B, H] carried in VMEM
    x = x_ref[0]                                   # [B, 2D]
    d_in = x.shape[1]
    H = h.shape[1]

    w_x = w_ref[0:d_in, :]                         # [2D, 3H]
    w_h = w_ref[d_in:d_in + H, :]                  # [H, 3H]  (offset 2D=8, 8-aligned)

    # x and h each touch the MXU exactly once (packed 3-gate matmuls).
    gx = jnp.dot(x, w_x, preferred_element_type=jnp.float32) + bx_ref[...]   # [B, 3H]
    gh = jnp.dot(h, w_h, preferred_element_type=jnp.float32) + bh_ref[...]   # [B, 3H]

    # Gate extraction via static lane slices of the packed pre-activations.
    s = jax.nn.sigmoid(gx + gh)                    # lanes [0,H)=r, [H,2H)=z
    r = s[:, 0:H]
    z = s[:, H:2 * H]
    n = jnp.tanh(gx[:, 2 * H:3 * H] + r * gh[:, 2 * H:3 * H])
    h_new = (1.0 - z) * n + z * h                  # [B, H]

    # Blend: observed rows take h_new exactly; unobserved rows pass h through.
    obs = jnp.broadcast_to(m_ref[0], h.shape)      # [B, H] f32 lane-broadcast
    out_ref[...] = jnp.where(obs > 0.5, h_new, h)


# ------------------------------ wrappers -------------------------------------

def _flatten_obs(X_obs):
    n_obs = X_obs.shape[0]
    feat = int(np.prod(X_obs.shape[1:])) if X_obs.ndim > 1 else 1
    return jnp.asarray(X_obs, jnp.float32).reshape(n_obs, feat)


def _densify_event(batch, X_obs, i_obs):
    """One-time scatter (outside the kernel): observed rows -> dense [B,2D] + mask."""
    x_flat = _flatten_obs(X_obs)
    i_obs = jnp.asarray(i_obs, jnp.int32)
    x_dense = jnp.zeros((batch, x_flat.shape[1]), jnp.float32).at[i_obs].set(x_flat)
    mask = jnp.zeros((batch, 1), jnp.float32).at[i_obs].set(1.0)
    return x_dense, mask


def _fused_call(h0, x_seq, m_seq, w_packed, b_x, b_h):
    T, B, d_in = x_seq.shape
    H = h0.shape[1]
    kw = w_packed.shape[0]
    grid_spec = pltpu.PrefetchScalarGridSpec(
        num_scalar_prefetch=0,
        grid=(T,),
        in_specs=[
            pl.BlockSpec((1, B, d_in), lambda t: (t, 0, 0)),   # per-event x
            pl.BlockSpec((1, B, 1), lambda t: (t, 0, 0)),      # per-event mask
            pl.BlockSpec((B, H), lambda t: (0, 0)),            # h0 (resident)
            pl.BlockSpec((kw, 3 * H), lambda t: (0, 0)),       # weight slab (resident)
            pl.BlockSpec((1, 3 * H), lambda t: (0, 0)),        # input biases (resident)
            pl.BlockSpec((1, 3 * H), lambda t: (0, 0)),        # hidden biases (resident)
        ],
        out_specs=pl.BlockSpec((B, H), lambda t: (0, 0)),      # carried h (resident)
    )
    return pl.pallas_call(
        _gru_obs_cell_kernel,
        out_shape=jax.ShapeDtypeStruct((B, H), jnp.float32),
        grid_spec=grid_spec,
        compiler_params=pltpu.CompilerParams(
            dimension_semantics=("arbitrary",)),   # sequential recurrence over events
    )(x_seq, m_seq, h0, w_packed, b_x, b_h)


_fused_call_jit = jax.jit(_fused_call)


def gru_obs_cell_forward(h, X_obs, i_obs, w_packed, b_x, b_h):
    """Single event == GRUObsCell.forward(h, X_obs, i_obs)."""
    x_d, m = _densify_event(h.shape[0], X_obs, i_obs)
    return _fused_call_jit(h, x_d[None], m[None], w_packed, b_x, b_h)


def gru_obs_cell_sequence(h, events, w_packed, b_x, b_h):
    """T consecutive forward() calls fused into one pallas_call (grid=(T,))."""
    xs, ms = [], []
    for X_obs, i_obs in events:
        x_d, m = _densify_event(h.shape[0], X_obs, i_obs)
        xs.append(x_d)
        ms.append(m)
    return _fused_call_jit(h, jnp.stack(xs), jnp.stack(ms), w_packed, b_x, b_h)


# ------------------------------ params & reference ---------------------------

def init_params(key, input_size, hidden_size):
    """nn.GRUCell(input_size*2, hidden_size) params, stored per-gate [in,H]/[1,H]."""
    d2 = input_size * 2
    H = hidden_size
    bound = 1.0 / float(np.sqrt(H))       # torch default uniform(-1/sqrt(H), 1/sqrt(H))
    ks = jax.random.split(key, 12)

    def u(k, shape):
        return jax.random.uniform(k, shape, jnp.float32, -bound, bound)

    return {
        "w_ir": u(ks[0], (d2, H)), "w_iz": u(ks[1], (d2, H)), "w_in": u(ks[2], (d2, H)),
        "w_hr": u(ks[3], (H, H)), "w_hz": u(ks[4], (H, H)), "w_hn": u(ks[5], (H, H)),
        "b_ir": u(ks[6], (1, H)), "b_iz": u(ks[7], (1, H)), "b_in": u(ks[8], (1, H)),
        "b_hr": u(ks[9], (1, H)), "b_hz": u(ks[10], (1, H)), "b_hn": u(ks[11], (1, H)),
    }


def pack_params(p):
    """Coalesce 12 per-gate tensors into 1 weight slab + 2 bias rows (gate order r|z|n)."""
    w_x = jnp.concatenate([p["w_ir"], p["w_iz"], p["w_in"]], axis=1)   # [2D, 3H]
    w_h = jnp.concatenate([p["w_hr"], p["w_hz"], p["w_hn"]], axis=1)   # [H, 3H]
    w = jnp.concatenate([w_x, w_h], axis=0)                            # [2D+H, 3H]
    b_x = jnp.concatenate([p["b_ir"], p["b_iz"], p["b_in"]], axis=1)   # [1, 3H]
    b_h = jnp.concatenate([p["b_hr"], p["b_hz"], p["b_hn"]], axis=1)   # [1, 3H]
    return w, b_x, b_h


def _gru_cell_reference(x, hi, p):
    r = jax.nn.sigmoid(x @ p["w_ir"] + p["b_ir"] + hi @ p["w_hr"] + p["b_hr"])
    z = jax.nn.sigmoid(x @ p["w_iz"] + p["b_iz"] + hi @ p["w_hz"] + p["b_hz"])
    n = jnp.tanh(x @ p["w_in"] + p["b_in"] + r * (hi @ p["w_hn"] + p["b_hn"]))
    return (1.0 - z) * n + z * hi


def gru_obs_cell_reference(h, X_obs, i_obs, p):
    """Pure-JAX mirror of GRUObsCell.forward (for correctness checking)."""
    x = _flatten_obs(X_obs)
    i_obs = jnp.asarray(i_obs, jnp.int32)
    h_new = _gru_cell_reference(x, h[i_obs], p)
    return h.at[i_obs].set(h_new)


# ------------------------------------ main -----------------------------------

if __name__ == "__main__":
    B = 8      # rows in h
    H = 32     # hidden_size
    D = 4      # input_size (GRUCell input width is D * 2)
    NDIM = 2   # trailing dim of X_obs, flattened with D -> 2*D features
    T = 5      # consecutive events fused into a single kernel launch

    root = jax.random.PRNGKey(0)
    keys = jax.random.split(root, 2 + T)
    kp, kh, kx = keys[0], keys[1], keys[2:]

    params = init_params(kp, D, H)
    w_packed, b_x, b_h = pack_params(params)
    h0 = jax.random.normal(kh, (B, H), jnp.float32)

    # Per-event observed indices (unique per event, one empty event).
    idx_per_event = [
        [0, 2, 3, 5, 7],
        [1, 4, 6],
        [0, 1, 2, 3, 4, 5, 6, 7],
        [],                       # n_obs == 0: h must pass through unchanged
        [3, 6],
    ]
    events = []
    for t, idx in enumerate(idx_per_event):
        i_obs = jnp.asarray(idx, jnp.int32)
        X_obs = jax.random.normal(kx[t], (len(idx), D, NDIM), jnp.float32)
        events.append((X_obs, i_obs))

    # Fused multi-event kernel: one pallas_call, grid=(T,), h resident in VMEM.
    h_seq = jax.block_until_ready(
        gru_obs_cell_sequence(h0, events, w_packed, b_x, b_h))

    # Single-event call (module forward semantics, T == 1).
    h_one = jax.block_until_ready(
        gru_obs_cell_forward(h0, events[0][0], events[0][1], w_packed, b_x, b_h))

    # Pure-JAX reference.
    h_ref = h0
    for X_obs, i_obs in events:
        h_ref = gru_obs_cell_reference(h_ref, X_obs, i_obs, params)
    h_ref = jax.block_until_ready(h_ref)
    h_ref_one = jax.block_until_ready(
        gru_obs_cell_reference(h0, events[0][0], events[0][1], params))

    np.testing.assert_allclose(np.asarray(h_seq), np.asarray(h_ref),
                               rtol=1e-4, atol=1e-5)
    np.testing.assert_allclose(np.asarray(h_one), np.asarray(h_ref_one),
                               rtol=1e-4, atol=1e-5)
    assert np.all(np.isfinite(np.asarray(h_seq)))
    print("KERNEL_OK")
</pallas_src>

<mosaic_0001>
module attributes {stable_mosaic.version = 11 : i64} {
  func.func @_gru_obs_cell_kernel(%arg0: i32, %arg1: memref<1x8x8xf32, #tpu.memory_space<vmem>>, %arg2: memref<1x8x1xf32, #tpu.memory_space<vmem>>, %arg3: memref<8x32xf32, #tpu.memory_space<vmem>>, %arg4: memref<40x96xf32, #tpu.memory_space<vmem>>, %arg5: memref<1x96xf32, #tpu.memory_space<vmem>>, %arg6: memref<1x96xf32, #tpu.memory_space<vmem>>, %arg7: memref<8x32xf32, #tpu.memory_space<vmem>>) attributes {dimension_semantics = [#tpu.dimension_semantics<arbitrary>], iteration_bounds = array<i64: 5>, scalar_prefetch = 0 : i64, scratch_operands = 0 : i64, tpu.core_type = #tpu.core_type<tc>, window_params = [{transform_indices = @transform_0, window_bounds = array<i64: 1, 8, 8>}, {transform_indices = @transform_1, window_bounds = array<i64: 1, 8, 1>}, {pipeline_mode = #tpu.pipeline_mode<synchronous>, transform_indices = @transform_2, window_bounds = array<i64: 8, 32>}, {pipeline_mode = #tpu.pipeline_mode<synchronous>, transform_indices = @transform_3, window_bounds = array<i64: 40, 96>}, {pipeline_mode = #tpu.pipeline_mode<synchronous>, transform_indices = @transform_4, window_bounds = array<i64: 1, 96>}, {pipeline_mode = #tpu.pipeline_mode<synchronous>, transform_indices = @transform_5, window_bounds = array<i64: 1, 96>}, {pipeline_mode = #tpu.pipeline_mode<synchronous>, transform_indices = @transform_6, window_bounds = array<i64: 8, 32>}]} {
    %c0_i32 = arith.constant 0 : i32
    %0 = arith.cmpi eq, %arg0, %c0_i32 : i32
    %1 = arith.extui %0 : i1 to i32
    %c0_i32_0 = arith.constant 0 : i32
    %2 = arith.cmpi ne, %1, %c0_i32_0 : i32
    scf.if %2 {
      %c0_21 = arith.constant 0 : index
      %c0_22 = arith.constant 0 : index
      %42 = vector.load %arg3[%c0_21, %c0_22] : memref<8x32xf32, #tpu.memory_space<vmem>>, vector<8x32xf32>
      %c0_23 = arith.constant 0 : index
      %c0_24 = arith.constant 0 : index
      %43 = vector.load %arg7[%c0_23, %c0_24] : memref<8x32xf32, #tpu.memory_space<vmem>>, vector<8x32xf32>
      tpu.vector_store %arg7[%c0_23, %c0_24], %42 {strides = array<i32>} : memref<8x32xf32, #tpu.memory_space<vmem>>, vector<8x32xf32>,
    } else {
    }
    %c0 = arith.constant 0 : index
    %c0_1 = arith.constant 0 : index
    %3 = vector.load %arg7[%c0, %c0_1] : memref<8x32xf32, #tpu.memory_space<vmem>>, vector<8x32xf32>
    %c0_2 = arith.constant 0 : index
    %c0_3 = arith.constant 0 : index
    %c0_4 = arith.constant 0 : index
    %4 = vector.load %arg1[%c0_2, %c0_3, %c0_4] : memref<1x8x8xf32, #tpu.memory_space<vmem>>, vector<1x8x8xf32>
    %5 = vector.shape_cast %4 : vector<1x8x8xf32> to vector<8x8xf32>
    %c0_5 = arith.constant 0 : index
    %c0_6 = arith.constant 0 : index
    %6 = vector.load %arg4[%c0_5, %c0_6] : memref<40x96xf32, #tpu.memory_space<vmem>>, vector<8x96xf32>
    %c8 = arith.constant 8 : index
    %c0_7 = arith.constant 0 : index
    %7 = vector.load %arg4[%c8, %c0_7] : memref<40x96xf32, #tpu.memory_space<vmem>>, vector<32x96xf32>
    %cst = arith.constant dense<0.000000e+00> : vector<8x96xf32>
    %8 = tpu.matmul %5, %6, %cst {dimension_numbers = #tpu.dot_dimension_numbers<[1], [0], [0], [1], [0, 0, 1, 1], [], []>} : vector<8x8xf32>, vector<8x96xf32>, vector<8x96xf32> -> vector<8x96xf32>
    %c0_8 = arith.constant 0 : index
    %c0_9 = arith.constant 0 : index
    %9 = vector.load %arg5[%c0_8, %c0_9] : memref<1x96xf32, #tpu.memory_space<vmem>>, vector<1x96xf32>
    %10 = vector.broadcast %9 : vector<1x96xf32> to vector<8x96xf32>
    %11 = arith.addf %8, %10 : vector<8x96xf32>
    %cst_10 = arith.constant dense<0.000000e+00> : vector<8x96xf32>
    %12 = tpu.matmul %3, %7, %cst_10 {dimension_numbers = #tpu.dot_dimension_numbers<[1], [0], [0], [1], [0, 0, 1, 1], [], []>} : vector<8x32xf32>, vector<32x96xf32>, vector<8x96xf32> -> vector<8x96xf32>
    %c0_11 = arith.constant 0 : index
    %c0_12 = arith.constant 0 : index
    %13 = vector.load %arg6[%c0_11, %c0_12] : memref<1x96xf32, #tpu.memory_space<vmem>>, vector<1x96xf32>
    %14 = vector.broadcast %13 : vector<1x96xf32> to vector<8x96xf32>
    %15 = arith.addf %12, %14 : vector<8x96xf32>
    %16 = arith.addf %11, %15 : vector<8x96xf32>
    %17 = arith.negf %16 : vector<8x96xf32>
    %18 = math.exp %17 : vector<8x96xf32>
    %cst_13 = arith.constant 1.000000e+00 : f32
    %19 = vector.broadcast %cst_13 : f32 to vector<8x96xf32>
    %20 = arith.addf %19, %18 : vector<8x96xf32>
    %21 = arith.divf %19, %20 : vector<8x96xf32>
    %22 = vector.extract_strided_slice %21 {offsets = [0, 0], sizes = [8, 32], strides = [1, 1]} : vector<8x96xf32> to vector<8x32xf32>
    %23 = vector.extract_strided_slice %21 {offsets = [0, 32], sizes = [8, 32], strides = [1, 1]} : vector<8x96xf32> to vector<8x32xf32>
    %24 = vector.extract_strided_slice %11 {offsets = [0, 64], sizes = [8, 32], strides = [1, 1]} : vector<8x96xf32> to vector<8x32xf32>
    %25 = vector.extract_strided_slice %15 {offsets = [0, 64], sizes = [8, 32], strides = [1, 1]} : vector<8x96xf32> to vector<8x32xf32>
    %26 = arith.mulf %22, %25 : vector<8x32xf32>
    %27 = arith.addf %24, %26 : vector<8x32xf32>
    %28 = math.tanh %27 : vector<8x32xf32>
    %cst_14 = arith.constant 1.000000e+00 : f32
    %29 = vector.broadcast %cst_14 : f32 to vector<8x32xf32>
    %30 = arith.subf %29, %23 : vector<8x32xf32>
    %31 = arith.mulf %30, %28 : vector<8x32xf32>
    %32 = arith.mulf %23, %3 : vector<8x32xf32>
    %33 = arith.addf %31, %32 : vector<8x32xf32>
    %c0_15 = arith.constant 0 : index
    %c0_16 = arith.constant 0 : index
    %c0_17 = arith.constant 0 : index
    %34 = vector.load %arg2[%c0_15, %c0_16, %c0_17] : memref<1x8x1xf32, #tpu.memory_space<vmem>>, vector<1x8x1xf32>
    %35 = vector.shape_cast %34 : vector<1x8x1xf32> to vector<8x1xf32>
    %36 = vector.shape_cast %35 : vector<8x1xf32> to vector<8x1xf32>
    %37 = vector.broadcast %36 : vector<8x1xf32> to vector<8x32xf32>
    %cst_18 = arith.constant 5.000000e-01 : f32
    %38 = vector.broadcast %cst_18 : f32 to vector<8x32xf32>
    %39 = arith.cmpf ogt, %37, %38 : vector<8x32xf32>
    %40 = arith.select %39, %33, %3 : vector<8x32xi1>, vector<8x32xf32>
    %c0_19 = arith.constant 0 : index
    %c0_20 = arith.constant 0 : index
    %41 = vector.load %arg7[%c0_19, %c0_20] : memref<8x32xf32, #tpu.memory_space<vmem>>, vector<8x32xf32>
    tpu.vector_store %arg7[%c0_19, %c0_20], %40 {strides = array<i32>} : memref<8x32xf32, #tpu.memory_space<vmem>>, vector<8x32xf32>,
    return
  }
  func.func @transform_0(%arg0: i32) -> (i32, i32, i32) {
    %c0_i32 = arith.constant 0 : i32
    %c0_i32_0 = arith.constant 0 : i32
    %c0_i32_1 = arith.constant 0 : i32
    return %arg0, %c0_i32, %c0_i32_0 : i32, i32, i32
  }
  func.func @transform_1(%arg0: i32) -> (i32, i32, i32) {
    %c0_i32 = arith.constant 0 : i32
    %c0_i32_0 = arith.constant 0 : i32
    %c0_i32_1 = arith.constant 0 : i32
    return %arg0, %c0_i32, %c0_i32_0 : i32, i32, i32
  }
  func.func @transform_2(%arg0: i32) -> (i32, i32) {
    %c0_i32 = arith.constant 0 : i32
    %c0_i32_0 = arith.constant 0 : i32
    %c0_i32_1 = arith.constant 0 : i32
    return %c0_i32, %c0_i32_0 : i32, i32
  }
  func.func @transform_3(%arg0: i32) -> (i32, i32) {
    %c0_i32 = arith.constant 0 : i32
    %c0_i32_0 = arith.constant 0 : i32
    %c0_i32_1 = arith.constant 0 : i32
    return %c0_i32, %c0_i32_0 : i32, i32
  }
  func.func @transform_4(%arg0: i32) -> (i32, i32) {
    %c0_i32 = arith.constant 0 : i32
    %c0_i32_0 = arith.constant 0 : i32
    %c0_i32_1 = arith.constant 0 : i32
    return %c0_i32, %c0_i32_0 : i32, i32
  }
  func.func @transform_5(%arg0: i32) -> (i32, i32) {
    %c0_i32 = arith.constant 0 : i32
    %c0_i32_0 = arith.constant 0 : i32
    %c0_i32_1 = arith.constant 0 : i32
    return %c0_i32, %c0_i32_0 : i32, i32
  }
  func.func @transform_6(%arg0: i32) -> (i32, i32) {
    %c0_i32 = arith.constant 0 : i32
    %c0_i32_0 = arith.constant 0 : i32
    %c0_i32_1 = arith.constant 0 : i32
    return %c0_i32, %c0_i32_0 : i32, i32
  }
}

</mosaic_0001>

<bundles_post_ra>
// kernel: _fused_call.1
= control target key start
LH: loop header
LB: loop body
LE: loop exit
PB: predicated region body
PF: predicated region fallthrough
CT: control target
= control target key end

     0   :  { %11 = vsyncpa [#allocation3], 0  ;;  %s777_s0 = inlined_call_operand.vmem [shape: f32[5,8,8], index: 0, kind: input, shape index: {}]   ;;  %s778_s1 = inlined_call_operand.vmem [shape: f32[5,8,1], index: 1, kind: input, shape index: {}]   ;;  %s779_s2 = inlined_call_operand.hbm [shape: f32[8,32], index: 2, kind: input, shape index: {}]   ;;  %s780_s3 = inlined_call_operand.hbm [shape: f32[40,96], index: 3, kind: input, shape index: {}]   ;;  %s781_s4 = inlined_call_operand.vmem [shape: f32[1,96], index: 4, kind: input, shape index: {}]   ;;  %s782_s5 = inlined_call_operand.vmem [shape: f32[1,96], index: 5, kind: input, shape index: {}]   ;;  %s783_s6 = inlined_call_operand.hbm [shape: f32[8,32], index: 6, kind: output, shape index: {}]  }
   0x1   :  { %12 = vsyncpa [#allocation6], 0 }
   0x2   :  { %13 = vsyncpa [#allocation4], 0  ;;  %s713_s21 = smov 0  }
   0x3 LB: > { %s193_s24 = sshll.u32 %s779_s2, 4  ;;  %s722_s25 = sadd.s32 4294967295, %s667_s21   ;;  %s667_s21 = sphi %s713_s21, %s19_s21   ;;  %s194_s24 = int_to_ptr.hbm [resolvable:$true] %s193_s24 }
   0x4   : > { %p492_p0 = scmp.ge.s32.totalorder %s667_s21, 1  ;;  %p181_p1 = scmp.lt.s32.totalorder %s667_s21, 6 }
   0x5   : > { %p493_p2 = scmp.ne.s32.totalorder %s722_s25, 0  ;;  %p528_p3 = scmp.eq.s32.totalorder %s722_s25, 0 }
   0x6   : > { %p728_p4 = pnand %p492_p0, %p181_p1  ;;  %s669_s27 = smov [#allocation2]  }
   0x7   : > { %s195_s28 = sshll.u32 %s669_s27, 4  ;;  %s204_s7 = sshll.u32 %s780_s3, 4  ;;  %s196_s28 = int_to_ptr.vmem [resolvable:$true] %s195_s28  ;;  %s205_s7 = int_to_ptr.hbm [resolvable:$true] %s204_s7 }
   0x8   : > { %p521_p5 = pneg %p728_p4  ;;  %s670_s8 = smov [#allocation5]  }
   0x9   : > { %s206_s9 = sshll.u32 %s670_s8, 4  ;;  %s671_s10 = smov 128   ;;  %s207_s9 = int_to_ptr.vmem [resolvable:$true] %s206_s9 }
   0xa   : > { %p522_p6 = pnand %p528_p3, %p521_p5  ;;  %s672_s11 = smov 8  }
   0xb   : > { %242 = sbr.rel (%p728_p4) target bundleno = 627 (0x273), region = 44 }
   0xc   : > { %524 = dma.hbm_to_vmem [thread:$0]  (!%p522_p6), %s194_s24, 128, %s196_s28, [#allocation3]  }
   0xd   : > { %527 = dma.hbm_to_vmem [thread:$0]  (!%p522_p6), %s205_s7, 640, %s207_s9, [#allocation6], %s671_s10, %s671_s10, %s672_s11  }
  0x10   : > { %654 = dma.done.wait (%p528_p3), [#allocation3], 128  }
  0x11   : > { %656 = vsyncadd (%p528_p3), [#allocation3], 4294967168 }
  0x12   : > { %658 = dma.done.wait (%p528_p3), [#allocation6], 640  }
  0x13   : > { %660 = vsyncadd (%p528_p3), [#allocation6], 4294966656  ;;  %p276_p7 = scmp.lt.s32.totalorder %s722_s25, 4 }
  0x14   : > { %287 = sbr.rel (%p493_p2) target bundleno = 27 (0x1b), region = 56 }
  0x15   : > { %s277_s12 = scalar_select %p276_p7, %s722_s25, 4 }
  0x17   : > { %s499_s13 = sshll.u32 %s277_s12, 3 }
  0x18   : > { %s279_s16 = scalar_lea.vmem %s777_s0, %s499_s13  ;;  %s757_s19 = scalar_lea.vmem %s778_s1, %s499_s13 }
  0x19   : > { %v288_v0 = vld [vmem:[#allocation2] sm:$0xff]  ;;  %vm289_vm0 = vcmask 261120  }
  0x1a   : > { %290 = vst.msk [vmem:[#allocation7] sm:$0xff] %vm289_vm0, %v288_v0 }
  0x1b PF: > { %v297_v1 = vld [vmem:[#allocation5 + $0x20] sm:$0xff]  ;;  %v296_v2 = vld [vmem:[#allocation5 + $0x18] sm:$0xff]  ;;  %vm302_vm1 = vcmask 64512   ;;  %v295_v5 = vld [vmem:[#allocation5 + $0x10] sm:$0xff]  ;;  %vm330_vm2 = vcmask 261120   ;;  %s673_s23 = smov 64  }
  0x1c   : > { %346 = vmatpush.msra.mxu1 %v297_v1  ;;  %v293_v3 = vld [vmem:[#allocation5] sm:$0xff]  ;;  %v292_v4 = vld [vmem:[%s279_s16] sm:$0xff]  ;;  %v294_v6 = vld [vmem:[#allocation5 + $0x8] sm:$0xff]  ;;  %v674_v31 = vmov 0   ;;  %s675_s27 = smov 96   ;;  %s676_s28 = smov 32  }
  0x1d   : > { %321 = vmatpush.msra.mxu0 %v293_v3  ;;  %v554_v8 = vld [vmem:[%s782_s5] ss:$0 sm:$0xff]  ;;  %551 = vset.pattern.permute.xlu2 %v674_v31  ;;  %s677_s29 = smov [#allocation7]   ;;  %s417_s9 = sshll.u32 %s783_s6, 4  ;;  %s418_s9 = int_to_ptr.hbm [resolvable:$true] %s417_s9 }
  0x1e   : > { %347 = vmatpush.msra.mxu1 %v296_v2  ;;  %502 = vmatmul.msk.f32.vlgmr.msra.gmra.mxu0 %vm302_vm1, %v292_v4  ;;  %v553_v11 = vld [vmem:[%s781_s4] ss:$0 sm:$0xff]  ;;  %s415_s30 = sshll.u32 %s677_s29, 4  ;;  %p532_p8 = scmp.eq.s32.totalorder %s722_s25, 4  ;;  %s416_s30 = int_to_ptr.vmem [resolvable:$true] %s415_s30 }
  0x1f   : > { %v396_v30 = vld [vmem:[%s757_s19] sm:$0xff]  ;;  %552 = vset.pattern.permute.xlu0 %v674_v31 }
  0x20   : > { %348 = vmatpush.msra.mxu1 %v295_v5  ;;  %399 = vperm.xlu2 %551, %v396_v30  }
  0x21   : > { %v291_v7 = vld [vmem:[#allocation7] sm:$0xff] }
  0x22   : > { %349 = vmatpush.msra.mxu1 %v294_v6 }
  0x23   : > { %503 = vmatmul.msk.f32.vlgmr.msra.gmra.mxu1 %vm330_vm2, %v291_v7 }
  0x7a   : > { %v400_v37 = vpop.permute.xlu2 %399 }
  0x7b   : > { %vm402_vm7 = vcmp.gt.f32.partialorder %v400_v37, 0.5 }
  0x9b   : > { %v323_v12 = vpop.f32.mrf.mxu0 }
  0x9c   : > { %v324_v13 = vadd.f32 %v553_v11, %v323_v12 }
  0xa0   : > { %v351_v9 = vpop.f32.mrf.mxu1 }
  0xa1   : > { %v352_v10 = vadd.f32 %v554_v8, %v351_v9 }
  0xa3   : > { %375 = vrot.lane.b32.xlu0 %v352_v10, %s673_s23  ;;  %v354_v14 = vadd.f32 %v352_v10, %v324_v13 }
  0xa5   : > { %v504_v15 = vmul.f32 -1.442695, %v354_v14 }
  0xa7   : > { %555 = vpow2.f32 %v504_v15 }
  0xad   : > { %v556_v16 = vpop.eup %555 }
  0xae   : > { %v358_v17 = vadd.f32 1.0, %v556_v16 }
  0xb0   : > { %557 = vrcp.f32 %v358_v17  ;;  %v370_v23 = vand.u32 2147483648, %v358_v17  ;;  %vm364_vm4 = vweird.f32 %v358_v17  ;;  %v368_v24 = vand.u32 2147483647, %v358_v17 }
  0xb2   : > { %v371_v26 = vor.u32 1.1754944e-38, %v370_v23  ;;  %vm369_vm6 = vcmp.eq.f32.partialorder %v368_v24, 8.507059e+37 }
  0xb6   : > { %v558_v18 = vpop.eup %557 }
  0xb7   : > { %v360_v19 = vmul.f32 %v558_v18, %v358_v17  ;;  %vm365_vm3 = vweird.f32 %v558_v18 }
  0xb8   : > { %vm366_vm5 = vmor %vm364_vm4, %vm365_vm3 }
  0xb9   : > { %v361_v20 = vsub.f32 1.0, %v360_v19 }
  0xbb   : > { %v362_v21 = vmul.f32 %v558_v18, %v361_v20 }
  0xbd   : > { %v363_v22 = vadd.f32 %v558_v18, %v362_v21 }
  0xbf   : > { %v367_v25 = vsel %vm366_vm5, %v558_v18, %v363_v22 }
  0xc0   : > { %v372_v28 = vsel %vm369_vm6, %v371_v26, %v367_v25 }
  0xc1   : > { %v385_v36 = vsub.f32 1.0, %v372_v28 }
 0x115   : > { %v376_v27 = vpop.permute.xlu0 %375 }
 0x116   : > { %v378_v29 = vmul.f32 %v376_v27, %v372_v28 }
 0x118   : > { %380 = vrot.lane.b32.xlu0 %v378_v29, %s673_s23 }
 0x18a   : > { %v381_v32 = vpop.permute.xlu0 %380 }
 0x18b   : > { %v383_v33 = vadd.f32 %v381_v32, %v324_v13 }
 0x18d   : > { %559 = vtanh.f32 %v383_v33 }
 0x193   : > { %v560_v34 = vpop.eup %559 }
 0x194   : > { %387 = vrot.lane.b32.xlu1 %v560_v34, %s675_s27 }
 0x19c   : > { %391 = vrot.lane.b32.xlu1 %v291_v7, %s676_s28 }
 0x206   : > { %v388_v35 = vpop.permute.xlu1 %387 }
 0x207   : > { %v390_v39 = vmul.f32 %v388_v35, %v385_v36 }
 0x20e   : > { %v392_v38 = vpop.permute.xlu1 %391 }
 0x20f   : > { %v394_v40 = vmul.f32 %v392_v38, %v372_v28 }
 0x211   : > { %v395_v41 = vadd.f32 %v394_v40, %v390_v39 }
 0x213   : > { %v403_v42 = vsel %vm402_vm7, %v395_v41, %v392_v38 }
 0x214   : > { %405 = vrot.lane.b32.xlu2 %v403_v42, %s675_s27 }
 0x26e   : > { %v406_v43 = vpop.permute.xlu2 %405 }
 0x26f   : > { %408 = vst.msk [vmem:[#allocation7] sm:$0xff] %vm330_vm2, %v406_v43 }
 0x270   : > { %518 = dma.vmem_to_hbm [thread:$0]  (%p532_p8), %s416_s30, 128, %s418_s9, [#allocation4]  }
 0x271   : > { %662 = dma.done.wait (%p532_p8), [#allocation4], 128  }
 0x272   : > { %664 = vsyncadd (%p532_p8), [#allocation4], 4294967168 }
 0x273 PF: > { %s19_s21 = sadd.s32 1, %s667_s21  }
 0x274   : > { %p16_p9 = scmp.ge.s32.totalorder %s19_s21, 7  }
 0x276   :  { %18 = sbr.rel (!%p16_p9) target bundleno = 3 (0x3), region = 87 }
 0x27b   :  { %431 = vsyncpa [#allocation3], 1 }
 0x27c   :  { %433 = vsyncpa [#allocation3 + $0x1], 1 }
 0x27d   :  { %434 = vsyncpa [#allocation6], 1 }
 0x27e   :  { %435 = vsyncpa [#allocation4], 1 }
 0x27f   :  { %437 = vsyncpa [#allocation4 + $0x1], 1 }

</bundles_post_ra>
